<compile_context>
chip_gen: v6e
topology: v6e:2x2x1
jax: 0.10.0
libtpu: 0.0.40
codegen_flags: <defaults>
</compile_context>

<pallas_src>
import functools

import jax
import jax.numpy as jnp
from jax.experimental import pallas as pl
from jax.experimental.pallas import tpu as pltpu

_LANES = 128          # full vreg lane width -> unmasked stores
_TILE_ROWS = 4096     # 4096 x 128 x 4B = 2 MiB per buffer (double-buffered in+out = 8 MiB)
_MIN_PALLAS_ELEMS = 1 << 16   # below this, a fused XLA elementwise op is strictly faster


def _time_embedding_kernel(x_ref, o_ref, *, inv_T):
    # (x % T) / T  ==  frac(x / T)  for T > 0 (sign-of-divisor semantics,
    # matching torch's float `%`).  Compute in f32, cast on store.
    x = x_ref[...].astype(jnp.float32)
    y = x * inv_T
    o_ref[...] = (y - jnp.floor(y)).astype(o_ref.dtype)


def _frac_xla(x, T):
    # Pure-XLA fallback for tiny tensors (fuses into neighbors, no HBM round-trip).
    y = x.astype(jnp.float32) * (1.0 / float(T))
    return (y - jnp.floor(y)).astype(x.dtype)


def time_embedding(x, T, *, tile_rows=_TILE_ROWS, force_pallas=False):
    """Pallas equivalent of TimeEmbedding(T).forward(x)."""
    T = float(T)
    assert T > 0.0, "TimeEmbedding requires T > 0 (torch `%` sign-of-divisor semantics)"

    total = x.size
    if total == 0:
        return x
    if total < _MIN_PALLAS_ELEMS and not force_pallas:
        return _frac_xla(x, T)

    itemsize = jnp.dtype(x.dtype).itemsize

    # ---- layout plumbing: lane-dense 2D slab --------------------------------
    rows = pl.cdiv(total, _LANES)
    padded = rows * _LANES
    xf = x.reshape(-1)
    if padded != total:
        xf = jnp.pad(xf, (0, padded - total))
    x2d = xf.reshape(rows, _LANES)

    # Block rows: full array if it fits in one tile (any row count is legal when
    # block == full dim), otherwise a multiple-of-8 tile of ~2 MiB.
    tr = rows if rows <= tile_rows else tile_rows
    grid = (pl.cdiv(rows, tr),)

    kernel = functools.partial(_time_embedding_kernel, inv_T=1.0 / T)

    out2d = pl.pallas_call(
        kernel,
        out_shape=jax.ShapeDtypeStruct((rows, _LANES), x.dtype),
        grid=grid,
        in_specs=[pl.BlockSpec((tr, _LANES), lambda i: (i, 0))],
        out_specs=pl.BlockSpec((tr, _LANES), lambda i: (i, 0)),
        compiler_params=pltpu.CompilerParams(
            dimension_semantics=("parallel",),   # megacore-shardable; pure elementwise
        ),
        cost_estimate=pl.CostEstimate(
            flops=3 * padded,            # mul + floor + sub per element
            transcendentals=0,
            bytes_accessed=2 * padded * itemsize,
        ),
    )(x2d)

    return out2d.reshape(-1)[:total].reshape(x.shape)


def _check(x, T, tol=1e-5):
    out = jax.block_until_ready(time_embedding(x, T, force_pallas=True))
    ref = jnp.mod(x.astype(jnp.float32), T) / T
    assert out.shape == x.shape and out.dtype == x.dtype
    # The output is a phase in [0, 1); compare with wrap-around so a ~1-ulp
    # boundary difference (0 vs ~1) between frac and mod-then-divide is allowed.
    diff = jnp.abs(out.astype(jnp.float32) - ref)
    diff = jnp.minimum(diff, 1.0 - diff)
    assert bool(jnp.all(diff < tol)), "mismatch vs reference"


if __name__ == "__main__":
    T = 4.0
    key = jax.random.PRNGKey(0)
    k0, k1, k2 = jax.random.split(key, 3)

    # Small "time values" tensor from the module's usage (includes negatives /
    # values outside [0, T)).  Forced through the Pallas path for the demo.
    x_small = jax.random.normal(k0, (2, 4, 16, 16), dtype=jnp.float32) * 10.0
    _check(x_small, T)

    # Larger tensor: exercises multi-block grid (rows > TILE_ROWS) + pipelining.
    x_big = jax.random.normal(k1, (8, 8, 128, 128), dtype=jnp.float32) * 10.0
    _check(x_big, T)

    # Ragged total (not a multiple of 128): exercises pad + unpad path.
    x_ragged = jax.random.normal(k2, (3, 5, 17, 13), dtype=jnp.float32) * 10.0
    _check(x_ragged, T)

    print("KERNEL_OK")
</pallas_src>

<mosaic_0001>
module attributes {stable_mosaic.version = 11 : i64} {
  func.func @_time_embedding_kernel(%arg0: i32, %arg1: memref<16x128xf32, #tpu.memory_space<vmem>>, %arg2: memref<16x128xf32, #tpu.memory_space<vmem>>) attributes {dimension_semantics = [#tpu.dimension_semantics<parallel>], iteration_bounds = array<i64: 1>, scalar_prefetch = 0 : i64, scratch_operands = 0 : i64, tpu.core_type = #tpu.core_type<tc>, window_params = [{transform_indices = @transform_0, window_bounds = array<i64: 16, 128>}, {transform_indices = @transform_1, window_bounds = array<i64: 16, 128>}]} {
    %c0 = arith.constant 0 : index
    %c0_0 = arith.constant 0 : index
    %0 = vector.load %arg1[%c0, %c0_0] : memref<16x128xf32, #tpu.memory_space<vmem>>, vector<16x128xf32>
    %cst = arith.constant 2.500000e-01 : f32
    %1 = vector.broadcast %cst : f32 to vector<16x128xf32>
    %2 = arith.mulf %0, %1 : vector<16x128xf32>
    %3 = math.floor %2 : vector<16x128xf32>
    %4 = arith.subf %2, %3 : vector<16x128xf32>
    %c0_1 = arith.constant 0 : index
    %c0_2 = arith.constant 0 : index
    %5 = vector.load %arg2[%c0_1, %c0_2] : memref<16x128xf32, #tpu.memory_space<vmem>>, vector<16x128xf32>
    tpu.vector_store %arg2[%c0_1, %c0_2], %4 {strides = array<i32>} : memref<16x128xf32, #tpu.memory_space<vmem>>, vector<16x128xf32>,
    return
  }
  func.func @transform_0(%arg0: i32) -> (i32, i32) {
    %c0_i32 = arith.constant 0 : i32
    %c0_i32_0 = arith.constant 0 : i32
    return %arg0, %c0_i32 : i32, i32
  }
  func.func @transform_1(%arg0: i32) -> (i32, i32) {
    %c0_i32 = arith.constant 0 : i32
    %c0_i32_0 = arith.constant 0 : i32
    return %arg0, %c0_i32 : i32, i32
  }
}

</mosaic_0001>

<bundles_post_ra>
// kernel: tpu_custom_call.1
= control target key start
LH: loop header
LB: loop body
LE: loop exit
PB: predicated region body
PF: predicated region fallthrough
CT: control target
= control target key end

     0   :  { %6 = vsyncpa [#allocation3], 0  ;;  %s118_s0 = inlined_call_operand.hbm [shape: f32[16,128], index: 0, kind: input, shape index: {}]   ;;  %s119_s1 = inlined_call_operand.hbm [shape: f32[16,128], index: 1, kind: output, shape index: {}]  }
   0x1   :  { %7 = vsyncpa [#allocation4], 0  ;;  %s98_s6 = smov [#allocation2]  }
   0x2   :  { %s13_s7 = sshll.u32 %s98_s6, 4  ;;  %s14_s7 = int_to_ptr.vmem [resolvable:$true] %s13_s7 }
   0x3   :  { %s62_s8 = scalar_lea.vmem %s14_s7, 256  ;;  %p67_p1 = scmp.lt.s32.totalorder %s14_s7, %s14_s7 }
   0x4   :  { %p63_p0 = scmp.ne.s32.totalorder %s14_s7, %s62_s8  ;;  %p68_p2 = scmp.lt.s32.totalorder %s62_s8, %s62_s8 }
   0x6   :  { %p69_p3 = por %p68_p2, %p67_p1 }
   0x8   :  { %p70_p4 = pnand %p69_p3, %p63_p0 }
   0xa   :  { %73 = shalt.err (!%p70_p4)
}
   0xb   :  { %s99_s9 = smov 128   ;;  %s100_s10 = smov 8  }
   0xc   :  { %19 = dma.hbm_to_vmem [thread:$0]  %s118_s0, 256, %s14_s7, [#allocation3], %s99_s9, %s99_s9, %s100_s10  }
   0xd   :  { %94 = dma.done.wait [#allocation3], 256  }
   0xe   :  { %95 = vsyncadd [#allocation3], 4294967040  ;;  %v23_v0 = vld [vmem:[#allocation2] sm:$0xff]  ;;  %v24_v1 = vld [vmem:[#allocation2 + $0x8] sm:$0xff]  ;;  %s101_s13 = smov [#allocation5]  }
   0xf   :  { %v25_v2 = vmul.f32 0.25, %v23_v0  ;;  %v26_v3 = vmul.f32 0.25, %v24_v1  ;;  %s38_s14 = sshll.u32 %s101_s13, 4  ;;  %s39_s14 = int_to_ptr.vmem [resolvable:$true] %s38_s14 }
  0x10   :  { %s74_s15 = scalar_lea.vmem %s39_s14, 256  ;;  %p79_p6 = scmp.lt.s32.totalorder %s39_s14, %s39_s14 }
  0x11   :  { %v27_v4 = vfloor.f32 %v25_v2  ;;  %v28_v5 = vfloor.f32 %v26_v3  ;;  %p75_p5 = scmp.ne.s32.totalorder %s39_s14, %s74_s15  ;;  %p80_p7 = scmp.lt.s32.totalorder %s74_s15, %s74_s15 }
  0x13   :  { %v29_v6 = vsub.f32 %v25_v2, %v27_v4  ;;  %v30_v7 = vsub.f32 %v26_v3, %v28_v5  ;;  %p81_p8 = por %p80_p7, %p79_p6 }
  0x15   :  { %31 = vst [vmem:[#allocation5] sm:$0xff] %v29_v6  ;;  %32 = vst [vmem:[#allocation5 + $0x8] sm:$0xff] %v30_v7  ;;  %p82_p9 = pnand %p81_p8, %p75_p5 }
  0x17   :  { %85 = shalt.err (!%p82_p9)
}
  0x18   :  { %44 = dma.vmem_to_hbm [thread:$0]  %s39_s14, 256, %s119_s1, [#allocation4], %s99_s9, %s99_s9, %s100_s10  }
  0x19   :  { %96 = dma.done.wait [#allocation4], 256  }
  0x1a   :  { %97 = vsyncadd [#allocation4], 4294967040 }
  0x1b   :  { %48 = vsyncpa [#allocation3], 1 }
  0x1c   :  { %49 = vsyncpa [#allocation4], 1 }

</bundles_post_ra>
